<compile_context>
chip_gen: v6e
topology: v6e:2x2x1
jax: 0.10.0
libtpu: 0.0.40
codegen_flags: <defaults>
</compile_context>

<pallas_src>
import math

import jax
import jax.numpy as jnp
from jax.experimental import pallas as pl
from jax.experimental.pallas import tpu as pltpu

EPSILON = 1e-07  # used by GaussianDistInstance.log_prob/entropy (not in forward)

# Below this many total elements (B*H + H*N + B*N) plain XLA wins: the op is
# launch-overhead bound and XLA fuses it into neighbors for free.
_PALLAS_MIN_ELEMENTS = 1 << 17


def _gaussian_mean_kernel(x_ref, w_ref, b_ref, mean_ref):
    # Linear layer on the MXU (f32 accumulate): (TM, H) @ (H, N) + (1, N).
    mu = jnp.dot(x_ref[...], w_ref[...], preferred_element_type=jnp.float32)
    mean_ref[...] = (mu + b_ref[...]).astype(mean_ref.dtype)


def _round_up(x, m):
    return ((x + m - 1) // m) * m


def _round_down(x, m):
    return (x // m) * m


def _vmem_cap_bytes():
    """Generation-aware usable VMEM budget (~75% of physical per-core VMEM)."""
    try:
        phys = int(pltpu.get_tpu_info().vmem_capacity_bytes)
    except Exception:
        phys = 64 << 20  # conservative fallback (v7x-sized)
    return int(phys * 0.75)


def _pick_tile_m(B, H, N, x_itemsize, w_itemsize, vmem_budget):
    """Batch tile size + grid length, derived from the VMEM budget.

    Per-row streaming cost: double-buffered input row + output row.
    Resident cost: single-buffered weight (pl.Buffered(1)) + bias.
    """
    resident = H * N * w_itemsize + 2 * N * 4
    per_row = 2 * (H * x_itemsize + N * 4)
    tm_cap = max((vmem_budget - resident) // per_row, 8)
    tm_cap = min(tm_cap, 1024)  # ~measured mem-bound sweet spot; no gain beyond

    if B >= 256:
        # Keep at least 2 tiles (4+ for large B) so both TensorCores on v7x
        # stay fed and the input DMA actually pipelines.
        target_tiles = 4 if B >= 1024 else 2
        tm_cap = min(tm_cap, _round_up(pl.cdiv(B, target_tiles), 8))

    if B <= tm_cap:
        return B, 1  # single full-batch tile (block equals full array dim)

    tm = max(_round_down(tm_cap, 8), 8)  # multiple of 8 -> fast path for partial tail
    return tm, pl.cdiv(B, tm)


def _vmem_limit_bytes(tm, H, N, x_itemsize, w_itemsize, cap):
    # double-buffered (input tile + output tile) + single-buffered weight/bias,
    # 1.5x headroom + 1 MiB for Mosaic internal scratch, floored at 4 MiB.
    tile_bytes = 2 * tm * (H * x_itemsize + N * 4) + H * N * w_itemsize + 2 * N * 4
    want = max(int(tile_bytes * 1.5) + (1 << 20), 4 << 20)
    return min(want, cap)


def gaussian_distribution_forward(inputs, weight_t, bias, log_sigma,
                                  *, broadcast_std=False, force_pallas=False):
    """GaussianDistribution.forward.

    Args:
      inputs:    (B, H) array (f32 or bf16 — used as stored, f32 accumulate).
      weight_t:  (H, N) nn.Linear weight stored PRE-TRANSPOSED (torch weight.T),
                 maintained in this layout so no per-call transpose is needed.
      bias:      (N,) float32.
      log_sigma: (1, N) float32.
      broadcast_std: if True, materialize std as (B, N); default returns the
                 lazy-broadcastable (1, N) = exp(log_sigma).
      force_pallas: bypass the small-shape XLA fallback (used by the demo/tests).
    Returns:
      (mean, std): mean is (B, N) f32; std is (1, N) f32 (or (B, N) if
      broadcast_std), equal to exp(mu*0 + log_sigma) for finite mu.
    """
    B, H = inputs.shape
    H2, N = weight_t.shape
    assert H2 == H, (H2, H)
    b2 = bias.reshape(1, N).astype(jnp.float32)

    work = B * H + H * N + B * N
    if (not force_pallas) and work < _PALLAS_MIN_ELEMENTS:
        # Tiny shapes: pallas_call dispatch + grid-step overhead dominates.
        mean = jnp.dot(inputs, weight_t, preferred_element_type=jnp.float32) + b2
        mean = mean.astype(jnp.float32)
    else:
        x_itemsize = inputs.dtype.itemsize
        w_itemsize = weight_t.dtype.itemsize
        vmem_cap = _vmem_cap_bytes()
        tm, grid_m = _pick_tile_m(B, H, N, x_itemsize, w_itemsize, vmem_cap)
        vmem_limit = _vmem_limit_bytes(tm, H, N, x_itemsize, w_itemsize, vmem_cap)

        cost = pl.CostEstimate(
            flops=2 * B * H * N,
            transcendentals=0,
            bytes_accessed=B * H * x_itemsize + H * N * w_itemsize + N * 4 + B * N * 4,
        )

        mean = pl.pallas_call(
            _gaussian_mean_kernel,
            out_shape=jax.ShapeDtypeStruct((B, N), jnp.float32),
            grid_spec=pltpu.PrefetchScalarGridSpec(
                num_scalar_prefetch=0,
                grid=(grid_m,),
                in_specs=[
                    # streamed batch tile (double-buffered by default)
                    pl.BlockSpec((tm, H), lambda i: (i, 0)),
                    # resident weight / bias: constant index_map -> fetch once,
                    # single buffer (no point double-buffering them)
                    pl.BlockSpec((H, N), lambda i: (0, 0),
                                 pipeline_mode=pl.Buffered(1)),
                    pl.BlockSpec((1, N), lambda i: (0, 0),
                                 pipeline_mode=pl.Buffered(1)),
                ],
                out_specs=pl.BlockSpec((tm, N), lambda i: (i, 0)),
            ),
            compiler_params=pltpu.CompilerParams(
                dimension_semantics=("parallel",),
                vmem_limit_bytes=vmem_limit,
            ),
            cost_estimate=cost,
        )(inputs, weight_t, b2)

    # std = exp(mu*0 + log_sigma) == exp(log_sigma) for finite mu.
    std = jnp.exp(log_sigma)
    if broadcast_std:
        std = jnp.broadcast_to(std, mean.shape)
    return mean, std


def init_params(key, hidden_size, num_outputs):
    """Deterministic parameter init matching the module's __init__.

    Linear: KaimingHeNormal (std = sqrt(2/fan_in)) scaled by kernel_gain=0.2,
    bias zero. log_sigma: zeros of shape (1, num_outputs).

    The weight is returned pre-transposed as (hidden_size, num_outputs) so the
    forward pass never materializes `weight.T` per call.
    """
    he_std = math.sqrt(2.0 / hidden_size)
    weight = jax.random.normal(key, (num_outputs, hidden_size),
                               dtype=jnp.float32) * he_std * 0.2
    weight_t = jnp.asarray(weight.T)  # one-time transpose at init, not per call
    bias = jnp.zeros((num_outputs,), dtype=jnp.float32)
    log_sigma = jnp.zeros((1, num_outputs), dtype=jnp.float32)
    return weight_t, bias, log_sigma


if __name__ == "__main__":
    key = jax.random.PRNGKey(0)
    k_in, k_param = jax.random.split(key)

    batch, hidden_size, num_outputs = 64, 32, 8
    x = jax.random.normal(k_in, (batch, hidden_size), dtype=jnp.float32)
    weight_t, bias, log_sigma = init_params(k_param, hidden_size, num_outputs)

    # Pallas path (forced: at this demo size the default dispatch would take
    # the small-shape XLA fallback).
    mean, std = gaussian_distribution_forward(
        x, weight_t, bias, log_sigma, force_pallas=True)
    jax.block_until_ready((mean, std))

    # Default dispatch (small-shape fallback) must agree with the kernel.
    mean_fb, std_fb = gaussian_distribution_forward(x, weight_t, bias, log_sigma)
    jax.block_until_ready((mean_fb, std_fb))

    # Reference in plain JAX (torch semantics: mu = x @ W^T + b).
    mean_ref = x @ weight_t + bias
    std_ref = jnp.exp(mean_ref * 0.0 + log_sigma)

    assert mean.shape == (batch, num_outputs)
    assert jnp.allclose(mean, mean_ref, atol=1e-5, rtol=1e-5)
    assert jnp.allclose(mean_fb, mean_ref, atol=1e-5, rtol=1e-5)
    assert jnp.allclose(jnp.broadcast_to(std, mean.shape), std_ref,
                        atol=1e-6, rtol=1e-6)
    assert jnp.allclose(jnp.broadcast_to(std_fb, mean.shape), std_ref,
                        atol=1e-6, rtol=1e-6)

    # TODO(synk): sample()/log_prob()/entropy() and the tanh_squash transform of
    # the DistInstance classes are not part of forward(); only the distribution
    # parameters (mean, std) are produced.
    print("KERNEL_OK")
</pallas_src>

<mosaic_0001>
module attributes {stable_mosaic.version = 11 : i64} {
  func.func @_gaussian_mean_kernel(%arg0: i32, %arg1: memref<64x32xf32, #tpu.memory_space<vmem>>, %arg2: memref<32x8xf32, #tpu.memory_space<vmem>>, %arg3: memref<1x8xf32, #tpu.memory_space<vmem>>, %arg4: memref<64x8xf32, #tpu.memory_space<vmem>>) attributes {dimension_semantics = [#tpu.dimension_semantics<parallel>], iteration_bounds = array<i64: 1>, scalar_prefetch = 0 : i64, scratch_operands = 0 : i64, tpu.core_type = #tpu.core_type<tc>, window_params = [{transform_indices = @transform_0, window_bounds = array<i64: 64, 32>}, {pipeline_mode = #tpu.pipeline_mode<synchronous>, transform_indices = @transform_1, window_bounds = array<i64: 32, 8>}, {pipeline_mode = #tpu.pipeline_mode<synchronous>, transform_indices = @transform_2, window_bounds = array<i64: 1, 8>}, {transform_indices = @transform_3, window_bounds = array<i64: 64, 8>}]} {
    %c0 = arith.constant 0 : index
    %c0_0 = arith.constant 0 : index
    %0 = vector.load %arg1[%c0, %c0_0] : memref<64x32xf32, #tpu.memory_space<vmem>>, vector<64x32xf32>
    %c0_1 = arith.constant 0 : index
    %c0_2 = arith.constant 0 : index
    %1 = vector.load %arg2[%c0_1, %c0_2] : memref<32x8xf32, #tpu.memory_space<vmem>>, vector<32x8xf32>
    %cst = arith.constant dense<0.000000e+00> : vector<64x8xf32>
    %2 = tpu.matmul %0, %1, %cst {dimension_numbers = #tpu.dot_dimension_numbers<[1], [0], [0], [1], [0, 0, 1, 1], [], []>} : vector<64x32xf32>, vector<32x8xf32>, vector<64x8xf32> -> vector<64x8xf32>
    %c0_3 = arith.constant 0 : index
    %c0_4 = arith.constant 0 : index
    %3 = vector.load %arg3[%c0_3, %c0_4] : memref<1x8xf32, #tpu.memory_space<vmem>>, vector<1x8xf32>
    %4 = vector.broadcast %3 : vector<1x8xf32> to vector<64x8xf32>
    %5 = arith.addf %2, %4 : vector<64x8xf32>
    %c0_5 = arith.constant 0 : index
    %c0_6 = arith.constant 0 : index
    %6 = vector.load %arg4[%c0_5, %c0_6] : memref<64x8xf32, #tpu.memory_space<vmem>>, vector<64x8xf32>
    tpu.vector_store %arg4[%c0_5, %c0_6], %5 {strides = array<i32>} : memref<64x8xf32, #tpu.memory_space<vmem>>, vector<64x8xf32>,
    return
  }
  func.func @transform_0(%arg0: i32) -> (i32, i32) {
    %c0_i32 = arith.constant 0 : i32
    %c0_i32_0 = arith.constant 0 : i32
    return %arg0, %c0_i32 : i32, i32
  }
  func.func @transform_1(%arg0: i32) -> (i32, i32) {
    %c0_i32 = arith.constant 0 : i32
    %c0_i32_0 = arith.constant 0 : i32
    %c0_i32_1 = arith.constant 0 : i32
    return %c0_i32, %c0_i32_0 : i32, i32
  }
  func.func @transform_2(%arg0: i32) -> (i32, i32) {
    %c0_i32 = arith.constant 0 : i32
    %c0_i32_0 = arith.constant 0 : i32
    %c0_i32_1 = arith.constant 0 : i32
    return %c0_i32, %c0_i32_0 : i32, i32
  }
  func.func @transform_3(%arg0: i32) -> (i32, i32) {
    %c0_i32 = arith.constant 0 : i32
    %c0_i32_0 = arith.constant 0 : i32
    return %arg0, %c0_i32 : i32, i32
  }
}

</mosaic_0001>

<bundles_post_ra>
// kernel: tpu_custom_call.1
= control target key start
LH: loop header
LB: loop body
LE: loop exit
PB: predicated region body
PF: predicated region fallthrough
CT: control target
= control target key end

     0   :  { %vm33_vm0 = vcmask 261120   ;;  %vm163_vm1 = vcmask 64512   ;;  %s324_s1 = inlined_call_operand.vmem [shape: f32[32,8], index: 1, kind: input, shape index: {}]   ;;  %s325_s0 = inlined_call_operand.vmem [shape: f32[64,32], index: 0, kind: input, shape index: {}]   ;;  %s326_s2 = inlined_call_operand.vmem [shape: f32[1,8], index: 2, kind: input, shape index: {}]   ;;  %s327_s3 = inlined_call_operand.vmem [shape: f32[64,8], index: 3, kind: output, shape index: {}]  }
   0x1   :  { %v25_v0 = vld [vmem:[%s324_s1 + $0x18] sm:$0xff]  ;;  %v24_v1 = vld [vmem:[%s324_s1 + $0x10] sm:$0xff]  ;;  %v23_v2 = vld [vmem:[%s324_s1 + $0x8] sm:$0xff] }
   0x2   :  { %197 = vmatprep.subr.mxu0 %v25_v0  ;;  %217 = vmatprep.subr.mxu1 %v25_v0  ;;  %v22_v3 = vld [vmem:[%s324_s1] sm:$0xff]  ;;  %v15_v6 = vld [vmem:[%s325_s0 + $0x8] sm:$0xff]  ;;  %v16_v8 = vld [vmem:[%s325_s0 + $0x10] sm:$0xff] }
   0x3   :  { %198 = vmatpush3.msra.mxu0 %v25_v0  ;;  %221 = vmatpush3.msra.mxu1 %v25_v0  ;;  %v14_v4 = vld [vmem:[%s325_s0] sm:$0xff]  ;;  %v19_v7 = vld [vmem:[%s325_s0 + $0x28] sm:$0xff]  ;;  %v20_v9 = vld [vmem:[%s325_s0 + $0x30] sm:$0xff] }
   0x4   :  { %199 = vmatprep.subr.mxu0 %v24_v1  ;;  %218 = vmatprep.subr.mxu1 %v24_v1  ;;  %v18_v5 = vld [vmem:[%s325_s0 + $0x20] sm:$0xff]  ;;  %v17_v10 = vld [vmem:[%s325_s0 + $0x18] sm:$0xff] }
   0x5   :  { %200 = vmatpush3.msra.mxu0 %v24_v1  ;;  %222 = vmatpush3.msra.mxu1 %v24_v1  ;;  %v21_v11 = vld [vmem:[%s325_s0 + $0x38] sm:$0xff]  ;;  %v176_v12 = vld [vmem:[%s326_s2] ss:$0 sm:$0xff] }
   0x6   :  { %201 = vmatprep.subr.mxu0 %v23_v2  ;;  %219 = vmatprep.subr.mxu1 %v23_v2 }
   0x7   :  { %202 = vmatpush3.msra.mxu0 %v23_v2  ;;  %223 = vmatpush3.msra.mxu1 %v23_v2 }
   0x8   :  { %203 = vmatprep.subr.mxu0 %v22_v3  ;;  %220 = vmatprep.subr.mxu1 %v22_v3 }
   0x9   :  { %204 = vmatpush3.msra.mxu0 %v22_v3  ;;  %224 = vmatpush3.msra.mxu1 %v22_v3 }
   0xa   :  { %205 = vmatprep.mubr.msk.f32.mxu0 %vm33_vm0, %v14_v4  ;;  %211 = vmatprep.mubr.msk.f32.mxu1 %vm33_vm0, %v18_v5 }
   0xb   :  { %206 = vmatmul.mubr.msk.f32.vlgmr.msra.gmra.mxu0 %vm33_vm0, %v15_v6  ;;  %212 = vmatmul.mubr.msk.f32.vlgmr.msra.gmra.mxu1 %vm33_vm0, %v19_v7 }
   0xc   :  { %208 = vmatprep.mubr.msk.f32.mxu0 %vm33_vm0, %v16_v8  ;;  %214 = vmatprep.mubr.msk.f32.mxu1 %vm33_vm0, %v20_v9 }
   0xf   :  { %209 = vmatmul.mubr.msk.f32.gmra.mxu0 %vm33_vm0, %v17_v10  ;;  %215 = vmatmul.mubr.msk.f32.gmra.mxu1 %vm33_vm0, %v21_v11 }
  0xcb   :  { %v207_v13 = vpop.f32.mrf.mxu0  ;;  %v213_v14 = vpop.f32.mrf.mxu1 }
  0xcc   :  { %v130_v15 = vadd.f32 %v207_v13, %v176_v12  ;;  %v150_v16 = vadd.f32 %v213_v14, %v176_v12 }
  0xcd   :  { %v124_v17 = vpop.f32.mrf.mxu0  ;;  %v144_v18 = vpop.f32.mrf.mxu1 }
  0xce   :  { %165 = vst.msk [vmem:[%s327_s3 + $0x8] sm:$0xff] %vm163_vm1, %v130_v15  ;;  %169 = vst.msk [vmem:[%s327_s3 + $0x28] sm:$0xff] %vm163_vm1, %v150_v16  ;;  %v125_v19 = vadd.f32 %v176_v12, %v124_v17  ;;  %v145_v20 = vadd.f32 %v176_v12, %v144_v18 }
  0xcf   :  { %v210_v21 = vpop.f32.mrf.mxu0  ;;  %v216_v22 = vpop.f32.mrf.mxu1 }
  0xd0   :  { %164 = vst.msk [vmem:[%s327_s3] sm:$0xff] %vm163_vm1, %v125_v19  ;;  %168 = vst.msk [vmem:[%s327_s3 + $0x20] sm:$0xff] %vm163_vm1, %v145_v20  ;;  %v140_v23 = vadd.f32 %v210_v21, %v176_v12  ;;  %v160_v24 = vadd.f32 %v216_v22, %v176_v12 }
  0xd1   :  { %v134_v25 = vpop.f32.mrf.mxu0  ;;  %v154_v26 = vpop.f32.mrf.mxu1 }
  0xd2   :  { %167 = vst.msk [vmem:[%s327_s3 + $0x18] sm:$0xff] %vm163_vm1, %v140_v23  ;;  %171 = vst.msk [vmem:[%s327_s3 + $0x38] sm:$0xff] %vm163_vm1, %v160_v24  ;;  %v135_v27 = vadd.f32 %v176_v12, %v134_v25  ;;  %v155_v28 = vadd.f32 %v176_v12, %v154_v26 }
  0xd4   :  { %166 = vst.msk [vmem:[%s327_s3 + $0x10] sm:$0xff] %vm163_vm1, %v135_v27  ;;  %170 = vst.msk [vmem:[%s327_s3 + $0x30] sm:$0xff] %vm163_vm1, %v155_v28 }

</bundles_post_ra>
